<compile_context>
chip_gen: v6e
topology: v6e:2x2x1
jax: 0.10.0
libtpu: 0.0.40
codegen_flags: <defaults>
</compile_context>

<pallas_src>
import jax
import jax.numpy as jnp
from jax.experimental import pallas as pl
from jax.experimental.pallas import tpu as pltpu


def _decoder_kernel(x_ref, w1_ref, b1_ref, w2_ref, b2_ref, o_ref):
    # x_ref : (1, Cin, tHW)   activation tile, pixels on the 128-lane axis
    # w1_ref: (Cmid, Cin)     BN-folded conv_1 weight (PyTorch (Cout, Cin) layout)
    # b1_ref: (Cmid, 1)       BN-folded conv_1 bias (f32)
    # w2_ref: (Cout, Cmid)    BN-folded conv_2 weight
    # b2_ref: (Cout, 1)       BN-folded conv_2 bias (f32)
    # o_ref : (1, Cout, tHW)
    x = x_ref[0]                                                      # (Cin, tHW)
    # jnp.dot promotes mixed dtypes; with a bf16 producer and bf16 weights this
    # is a bf16 MXU matmul with f32 accumulation.
    h = jnp.dot(w1_ref[...], x, preferred_element_type=jnp.float32)   # (Cmid, tHW)
    h = jnp.maximum(h + b1_ref[...], 0.0)          # conv_1 + BN + ReLU, f32 epilogue
    # h never touches HBM -> keep it f32; only the tiny W2 is promoted.
    y = jnp.dot(w2_ref[...].astype(jnp.float32), h,
                preferred_element_type=jnp.float32)                   # (Cout, tHW)
    y = jnp.maximum(y + b2_ref[...], 0.0)          # conv_2 + BN + ReLU, f32 epilogue
    o_ref[0] = y.astype(o_ref.dtype)


def decoder_block_pallas(x_nchw, w1, b1, w2, b2, *, t_hw=8192,
                         compute_dtype=None, out_dtype=None,
                         x_buffers=3, vmem_limit_bytes=32 * 1024 * 1024):
    """Forward pass of decoder_block (eval-mode BN folded into w/b).

    x_nchw: (N, Cin, H, W) — streamed from HBM in its own dtype (no wrapper
    cast).  w1: (Cmid, Cin), b1: (Cmid,), w2: (Cout, Cmid), b2: (Cout,).

    compute_dtype (default: x dtype) is the dtype the folded weights are cast
    to; out_dtype (default: compute_dtype) is the output storage dtype.  For
    bandwidth-bound deployments (especially v5e, and v6e/v7x inference) have
    the producer emit bf16 activations and leave the defaults: the kernel then
    reads bf16, matmuls on the MXU with f32 accumulation, keeps the bias+ReLU
    epilogue in f32, and writes bf16.
    """
    N, Cin, H, W = x_nchw.shape
    Cmid = w1.shape[0]
    Cout = w2.shape[0]
    HW = H * W

    if compute_dtype is None:
        compute_dtype = x_nchw.dtype
    if out_dtype is None:
        out_dtype = compute_dtype

    x = x_nchw.reshape(N, Cin, HW)                 # metadata-only; no copy, no cast
    w1c = w1.astype(compute_dtype)
    w2c = w2.astype(compute_dtype)
    b1_2d = b1.reshape(Cmid, 1).astype(jnp.float32)
    b2_2d = b2.reshape(Cout, 1).astype(jnp.float32)

    x_bytes = jnp.dtype(x.dtype).itemsize
    o_bytes = jnp.dtype(out_dtype).itemsize
    w_bytes = jnp.dtype(compute_dtype).itemsize

    # --- Pixel-tile selection -------------------------------------------------
    # Big tiles amortize the ~0.35us/step fixed cost; cap so the multi-buffered
    # working set stays well inside scoped VMEM (matters for wide real decoder
    # blocks where Cin can be 512+).
    n_xbuf = max(2, int(x_buffers))
    per_px_bytes = Cin * x_bytes * n_xbuf + Cout * o_bytes * 2
    t_cap = max(128, ((vmem_limit_bytes // 2) // per_px_bytes) // 128 * 128)
    t = min(int(t_hw), t_cap)
    if t >= HW:
        t = HW                                     # single lane-dense block
    else:
        t = max(128, (t // 128) * 128)             # lane-dense multiple of 128
    n_blk = pl.cdiv(HW, t)

    # v7x has 2 TensorCores per chip: make sure the grid has >= 2 blocks so
    # neither core sits idle (only possible if HW > 128 without violating the
    # (8,128) block constraint).
    if N * n_blk < 2 and HW > 128:
        t = max(128, ((pl.cdiv(HW, 2) + 127) // 128) * 128)
        n_blk = pl.cdiv(HW, t)

    # --- X input spec (optionally deeper than double-buffered) ----------------
    x_index = lambda n, j: (n, 0, j)
    n_steps = N * n_blk
    x_buf_eff = min(n_xbuf, n_steps)
    if x_buf_eff > 2:
        x_spec = pl.BlockSpec((1, Cin, t), x_index,
                              pipeline_mode=pl.Buffered(x_buf_eff))
    else:
        x_spec = pl.BlockSpec((1, Cin, t), x_index)

    # --- Cost estimate: this op lives at the HBM roofline ---------------------
    flops = 2 * N * HW * (Cmid * Cin + Cout * Cmid)
    bytes_accessed = (N * HW * (Cin * x_bytes + Cout * o_bytes)
                      + (Cmid * Cin + Cout * Cmid) * w_bytes
                      + (Cmid + Cout) * 4)
    cost = pl.CostEstimate(flops=flops, transcendentals=0,
                           bytes_accessed=bytes_accessed)

    out = pl.pallas_call(
        _decoder_kernel,
        out_shape=jax.ShapeDtypeStruct((N, Cout, HW), out_dtype),
        grid_spec=pltpu.PrefetchScalarGridSpec(
            num_scalar_prefetch=0,
            grid=(N, n_blk),
            in_specs=[
                x_spec,                                               # X tile
                pl.BlockSpec((Cmid, Cin), lambda n, j: (0, 0)),       # W1 (resident)
                pl.BlockSpec((Cmid, 1), lambda n, j: (0, 0)),         # b1
                pl.BlockSpec((Cout, Cmid), lambda n, j: (0, 0)),      # W2 (resident)
                pl.BlockSpec((Cout, 1), lambda n, j: (0, 0)),         # b2
            ],
            out_specs=pl.BlockSpec((1, Cout, t), lambda n, j: (n, 0, j)),
        ),
        compiler_params=pltpu.CompilerParams(
            dimension_semantics=("parallel", "parallel"),
            vmem_limit_bytes=vmem_limit_bytes,
        ),
        cost_estimate=cost,
    )(x, w1c, b1_2d, w2c, b2_2d)

    return out.reshape(N, Cout, H, W)


def _fold_bn(w_oi, b_o, gamma, beta, mean, var, eps=1e-5):
    """Fold eval-mode BatchNorm into a (Cout, Cin) conv weight and (Cout,) bias."""
    scale = gamma / jnp.sqrt(var + eps)          # (Cout,)
    shift = beta - mean * scale                  # (Cout,)
    return w_oi * scale[:, None], b_o * scale + shift


if __name__ == "__main__":
    # Small shapes consistent with decoder_block(in_channels=8, out_channels=4).
    N, Cin, H, W = 2, 8, 16, 16
    Cmid = Cin // 2          # 4
    Cout = 4

    key = jax.random.PRNGKey(0)
    ks = jax.random.split(key, 12)

    x = jax.random.normal(ks[0], (N, Cin, H, W), dtype=jnp.float32)

    # conv_1: Conv2d(Cin -> Cmid, k=1) + BN(Cmid)
    w1_oi = jax.random.normal(ks[1], (Cmid, Cin), dtype=jnp.float32) * 0.1
    b1 = jax.random.normal(ks[2], (Cmid,), dtype=jnp.float32) * 0.1
    g1 = 1.0 + 0.1 * jax.random.normal(ks[3], (Cmid,), dtype=jnp.float32)
    be1 = 0.1 * jax.random.normal(ks[4], (Cmid,), dtype=jnp.float32)
    m1 = 0.1 * jax.random.normal(ks[5], (Cmid,), dtype=jnp.float32)
    v1 = jax.random.uniform(ks[6], (Cmid,), minval=0.5, maxval=1.5, dtype=jnp.float32)

    # conv_2: Conv2d(Cmid -> Cout, k=1) + BN(Cout)
    w2_oi = jax.random.normal(ks[7], (Cout, Cmid), dtype=jnp.float32) * 0.1
    b2 = jax.random.normal(ks[8], (Cout,), dtype=jnp.float32) * 0.1
    g2 = 1.0 + 0.1 * jax.random.normal(ks[9], (Cout,), dtype=jnp.float32)
    be2 = 0.1 * jax.random.normal(ks[10], (Cout,), dtype=jnp.float32)
    m2 = 0.1 * jax.random.normal(ks[11], (Cout,), dtype=jnp.float32)
    v2 = jnp.ones((Cout,), dtype=jnp.float32)

    # Fold BN (inference mode) into the 1x1 conv weights/biases.
    # TODO(synk): training-mode BN (batch statistics + running-stat updates) is
    # not implemented; the kernel reproduces eval()-mode semantics of the module.
    w1f, b1f = _fold_bn(w1_oi, b1, g1, be1, m1, v1)
    w2f, b2f = _fold_bn(w2_oi, b2, g2, be2, m2, v2)

    # Plain-JAX reference of the same math (NCHW, channels contracted).
    x_mat = x.reshape(N, Cin, H * W)
    ref = jnp.maximum(jnp.einsum("oc,ncp->nop", w1f, x_mat) + b1f[None, :, None], 0.0)
    ref = jnp.maximum(jnp.einsum("oc,ncp->nop", w2f, ref) + b2f[None, :, None], 0.0)
    ref = ref.reshape(N, Cout, H, W)

    # f32 path (exact), default large tile -> one block per image.
    out = decoder_block_pallas(x, w1f, b1f, w2f, b2f)
    out = jax.block_until_ready(out)
    assert out.shape == (N, Cout, H, W)
    assert out.dtype == jnp.float32
    assert jnp.allclose(out, ref, atol=1e-5, rtol=1e-5)

    # Multi-block path (exercises ragged-safe tiling + Buffered X stream).
    out_tiled = decoder_block_pallas(x, w1f, b1f, w2f, b2f, t_hw=128)
    out_tiled = jax.block_until_ready(out_tiled)
    assert jnp.allclose(out_tiled, ref, atol=1e-5, rtol=1e-5)

    # Single-image path: grid is auto-split so both v7x TensorCores get work.
    out_single = decoder_block_pallas(x[:1], w1f, b1f, w2f, b2f)
    out_single = jax.block_until_ready(out_single)
    assert jnp.allclose(out_single, ref[:1], atol=1e-5, rtol=1e-5)

    # bf16 path: producer supplies bf16 activations; weights/output bf16,
    # f32 accumulation + f32 epilogue inside the kernel.
    x_bf16 = x.astype(jnp.bfloat16)
    out_bf16 = decoder_block_pallas(x_bf16, w1f, b1f, w2f, b2f,
                                    compute_dtype=jnp.bfloat16)
    out_bf16 = jax.block_until_ready(out_bf16)
    assert out_bf16.dtype == jnp.bfloat16
    assert jnp.allclose(out_bf16.astype(jnp.float32), ref, atol=5e-2, rtol=5e-2)

    print("KERNEL_OK")
</pallas_src>

<mosaic_0001>
module attributes {stable_mosaic.version = 11 : i64} {
  func.func @_decoder_kernel(%arg0: i32, %arg1: i32, %arg2: memref<1x8x256xf32, #tpu.memory_space<vmem>>, %arg3: memref<4x8xf32, #tpu.memory_space<vmem>>, %arg4: memref<4x1xf32, #tpu.memory_space<vmem>>, %arg5: memref<4x4xf32, #tpu.memory_space<vmem>>, %arg6: memref<4x1xf32, #tpu.memory_space<vmem>>, %arg7: memref<1x4x256xf32, #tpu.memory_space<vmem>>) attributes {dimension_semantics = [#tpu.dimension_semantics<parallel>, #tpu.dimension_semantics<parallel>], iteration_bounds = array<i64: 2, 1>, scalar_prefetch = 0 : i64, scratch_operands = 0 : i64, tpu.core_type = #tpu.core_type<tc>, window_params = [{transform_indices = @transform_0, window_bounds = array<i64: 1, 8, 256>}, {pipeline_mode = #tpu.pipeline_mode<synchronous>, transform_indices = @transform_1, window_bounds = array<i64: 4, 8>}, {pipeline_mode = #tpu.pipeline_mode<synchronous>, transform_indices = @transform_2, window_bounds = array<i64: 4, 1>}, {pipeline_mode = #tpu.pipeline_mode<synchronous>, transform_indices = @transform_3, window_bounds = array<i64: 4, 4>}, {pipeline_mode = #tpu.pipeline_mode<synchronous>, transform_indices = @transform_4, window_bounds = array<i64: 4, 1>}, {transform_indices = @transform_5, window_bounds = array<i64: 1, 4, 256>}]} {
    %c0 = arith.constant 0 : index
    %c0_0 = arith.constant 0 : index
    %c0_1 = arith.constant 0 : index
    %0 = vector.load %arg2[%c0, %c0_0, %c0_1] : memref<1x8x256xf32, #tpu.memory_space<vmem>>, vector<1x8x256xf32>
    %1 = vector.shape_cast %0 : vector<1x8x256xf32> to vector<8x256xf32>
    %c0_2 = arith.constant 0 : index
    %c0_3 = arith.constant 0 : index
    %2 = vector.load %arg3[%c0_2, %c0_3] : memref<4x8xf32, #tpu.memory_space<vmem>>, vector<4x8xf32>
    %cst = arith.constant dense<0.000000e+00> : vector<4x256xf32>
    %3 = tpu.matmul %2, %1, %cst {dimension_numbers = #tpu.dot_dimension_numbers<[1], [0], [0], [1], [0, 0, 1, 1], [], []>} : vector<4x8xf32>, vector<8x256xf32>, vector<4x256xf32> -> vector<4x256xf32>
    %c0_4 = arith.constant 0 : index
    %c0_5 = arith.constant 0 : index
    %4 = vector.load %arg4[%c0_4, %c0_5] : memref<4x1xf32, #tpu.memory_space<vmem>>, vector<4x1xf32>
    %5 = vector.broadcast %4 : vector<4x1xf32> to vector<4x256xf32>
    %6 = arith.addf %3, %5 : vector<4x256xf32>
    %cst_6 = arith.constant 0.000000e+00 : f32
    %7 = vector.broadcast %cst_6 : f32 to vector<4x256xf32>
    %8 = arith.maximumf %6, %7 : vector<4x256xf32>
    %c0_7 = arith.constant 0 : index
    %c0_8 = arith.constant 0 : index
    %9 = vector.load %arg5[%c0_7, %c0_8] : memref<4x4xf32, #tpu.memory_space<vmem>>, vector<4x4xf32>
    %cst_9 = arith.constant dense<0.000000e+00> : vector<4x256xf32>
    %10 = tpu.matmul %9, %8, %cst_9 {dimension_numbers = #tpu.dot_dimension_numbers<[1], [0], [0], [1], [0, 0, 1, 1], [], []>} : vector<4x4xf32>, vector<4x256xf32>, vector<4x256xf32> -> vector<4x256xf32>
    %c0_10 = arith.constant 0 : index
    %c0_11 = arith.constant 0 : index
    %11 = vector.load %arg6[%c0_10, %c0_11] : memref<4x1xf32, #tpu.memory_space<vmem>>, vector<4x1xf32>
    %12 = vector.broadcast %11 : vector<4x1xf32> to vector<4x256xf32>
    %13 = arith.addf %10, %12 : vector<4x256xf32>
    %cst_12 = arith.constant 0.000000e+00 : f32
    %14 = vector.broadcast %cst_12 : f32 to vector<4x256xf32>
    %15 = arith.maximumf %13, %14 : vector<4x256xf32>
    %c0_13 = arith.constant 0 : index
    %c0_14 = arith.constant 0 : index
    %c0_15 = arith.constant 0 : index
    %16 = vector.load %arg7[%c0_13, %c0_14, %c0_15] : memref<1x4x256xf32, #tpu.memory_space<vmem>>, vector<1x4x256xf32>
    %17 = vector.shape_cast %16 : vector<1x4x256xf32> to vector<4x256xf32>
    %18 = vector.shape_cast %15 : vector<4x256xf32> to vector<1x4x256xf32>
    tpu.vector_store %arg7[%c0_13, %c0_14, %c0_15], %18 {strides = array<i32>} : memref<1x4x256xf32, #tpu.memory_space<vmem>>, vector<1x4x256xf32>,
    return
  }
  func.func @transform_0(%arg0: i32, %arg1: i32) -> (i32, i32, i32) {
    %c0_i32 = arith.constant 0 : i32
    %c0_i32_0 = arith.constant 0 : i32
    return %arg0, %c0_i32, %arg1 : i32, i32, i32
  }
  func.func @transform_1(%arg0: i32, %arg1: i32) -> (i32, i32) {
    %c0_i32 = arith.constant 0 : i32
    %c0_i32_0 = arith.constant 0 : i32
    %c0_i32_1 = arith.constant 0 : i32
    return %c0_i32, %c0_i32_0 : i32, i32
  }
  func.func @transform_2(%arg0: i32, %arg1: i32) -> (i32, i32) {
    %c0_i32 = arith.constant 0 : i32
    %c0_i32_0 = arith.constant 0 : i32
    %c0_i32_1 = arith.constant 0 : i32
    return %c0_i32, %c0_i32_0 : i32, i32
  }
  func.func @transform_3(%arg0: i32, %arg1: i32) -> (i32, i32) {
    %c0_i32 = arith.constant 0 : i32
    %c0_i32_0 = arith.constant 0 : i32
    %c0_i32_1 = arith.constant 0 : i32
    return %c0_i32, %c0_i32_0 : i32, i32
  }
  func.func @transform_4(%arg0: i32, %arg1: i32) -> (i32, i32) {
    %c0_i32 = arith.constant 0 : i32
    %c0_i32_0 = arith.constant 0 : i32
    %c0_i32_1 = arith.constant 0 : i32
    return %c0_i32, %c0_i32_0 : i32, i32
  }
  func.func @transform_5(%arg0: i32, %arg1: i32) -> (i32, i32, i32) {
    %c0_i32 = arith.constant 0 : i32
    %c0_i32_0 = arith.constant 0 : i32
    return %arg0, %c0_i32, %arg1 : i32, i32, i32
  }
}

</mosaic_0001>

<bundles_post_ra>
// kernel: tpu_custom_call.1
= control target key start
LH: loop header
LB: loop body
LE: loop exit
PB: predicated region body
PF: predicated region fallthrough
CT: control target
= control target key end

     0   :  { %10 = vsyncpa [#allocation3], 0  ;;  %s921_s0 = inlined_call_operand.hbm [shape: f32[2,8,256], index: 0, kind: input, shape index: {}]   ;;  %s922_s1 = inlined_call_operand.vmem [shape: f32[4,8], index: 1, kind: input, shape index: {}]   ;;  %s923_s2 = inlined_call_operand.vmem [shape: f32[4,1], index: 2, kind: input, shape index: {}]   ;;  %s924_s3 = inlined_call_operand.vmem [shape: f32[4,4], index: 3, kind: input, shape index: {}]   ;;  %s925_s4 = inlined_call_operand.vmem [shape: f32[4,1], index: 4, kind: input, shape index: {}]   ;;  %s926_s5 = inlined_call_operand.hbm [shape: f32[2,4,256], index: 5, kind: output, shape index: {}]  }
   0x1   :  { %12 = vsyncpa [#allocation3 + $0x1], 0 }
   0x2   :  { %13 = vsyncpa [#allocation4], 0 }
   0x3   :  { %15 = vsyncpa [#allocation4 + $0x1], 0  ;;  %s774_s18 = smov 0   ;;  %s776_s19 = smov 0  }
   0x4   :  { %s778_s20 = smov 0   ;;  %s780_s21 = smov 0  }
   0x5   :  { %s782_s22 = smov 0   ;;  %s784_s23 = smov 0  }
   0x6 LB: > { %s544_s24 = sadd.s32 4294967295, %s738_s23   ;;  %s545_s25 = sadd.s32 4294967294, %s738_s23   ;;  %s738_s23 = sphi %s784_s23, %s21_s23   ;;  %s734_s22 = sphi %s782_s22, %s938_s22   ;;  %s730_s21 = sphi %s780_s21, %s937_s21   ;;  %s726_s20 = sphi %s778_s20, %s936_s20   ;;  %s722_s19 = sphi %s776_s19, %s935_s19   ;;  %s718_s18 = sphi %s774_s18, %s934_s18  }
   0x7   : > { %s33_s26 = sadd.s32 1, %s734_s22  ;;  %s42_s27 = sadd.s32 1, %s726_s20 }
   0x8   : > { %p35_p0 = scmp.ge.s32.totalorder %s33_s26, 2  ;;  %p49_p1 = scmp.ne.s32.totalorder %s726_s20, %s722_s19 }
   0x9   : > { %p50_p2 = scmp.eq.s32.totalorder %s738_s23, 0  ;;  %p55_p3 = scmp.ne.s32.totalorder %s722_s19, %s718_s18 }
   0xa   : > { %s940_s26 = smov (%p35_p0, %s33_s26), 0  ;;  %p56_p5 = scmp.eq.s32.totalorder %s544_s24, 0 }
   0xb   : > { %p815_p4 = por %p50_p2, %p49_p1  ;;  %s37_s29 = ssub.s32 %s734_s22, %s940_s26 }
   0xc   : > { %p165_p6 = scmp.eq.s32.totalorder %s544_s24, 1  ;;  %p40_p7 = scmp.eq.s32.totalorder %s37_s29, 0 }
   0xd   : > { %p821_p8 = por %p56_p5, %p55_p3  ;;  %p171_p10 = scmp.eq.s32.totalorder %s545_s25, 1 }
   0xe   : > { %p825_p9 = por %p165_p6, %p49_p1  ;;  %p577_p13 = scmp.lt.s32.totalorder %s738_s23, 2 }
   0xf   : > { %s830_s7 = scalar_select %p40_p7, %s726_s20, %s42_s27  }
  0x10   : > { %p832_p11 = por %p171_p10, %p55_p3  ;;  %s203_s9 = sand.u32 1, %s726_s20  }
  0x11   : > { %s548_s10 = sshll.u32 %s203_s9, 4  ;;  %s563_s11 = sshll.u32 %s734_s22, 8 }
  0x12   : > { %s930_s8 = scalar_select %p832_p11, 1, 0 }
  0x13   : > { %s215_s14 = scalar_lea.hbm %s921_s0, %s563_s11  ;;  %s207_s15 = scalar_lea.vmem [#allocation2], %s548_s10 }
  0x14   : > { %s217_s16 = sshll.u32 %s207_s15, 4  ;;  %p845_p0 = pnand %p577_p13, %p815_p4  ;;  %s218_s16 = int_to_ptr.vmem [resolvable:$true] %s217_s16 }
  0x15   : > { %p551_p1 = scmp.ge.s32.totalorder %s738_s23, 1  ;;  %p222_p2 = scmp.lt.s32.totalorder %s738_s23, 3 }
  0x16   : > { %s204_s24 = scalar_lea.sflag [#allocation3], %s203_s9  ;;  %p632_p3 = pneg %p845_p0 }
  0x17   : > { %s643_s25 = scalar_lea.vmem %s218_s16, 256  ;;  %s740_s27 = smov [#allocation2]  }
  0x18   : > { %p644_p5 = scmp.ne.s32.totalorder %s218_s16, %s643_s25  ;;  %s648_s29 = sshll.u32 %s740_s27, 4  ;;  %s649_s29 = int_to_ptr.vmem [resolvable:$false] %s648_s29 }
  0x19   : > { %s650_s10 = scalar_lea.vmem %s649_s29, 512  ;;  %p651_p10 = scmp.lt.s32.totalorder %s218_s16, %s649_s29 }
  0x1a   : > { %p646_p6 = pnand %p644_p5, %p632_p3  ;;  %p652_p12 = scmp.lt.s32.totalorder %s650_s10, %s643_s25 }
  0x1c   : > { %p647_p7 = pneg %p646_p6  ;;  %p653_p4 = por %p652_p12, %p651_p10 }
  0x1e   : > { %p654_p13 = pnand %p653_p4, %p647_p7 }
  0x20   : > { %657 = shalt.err (!%p654_p13)
}
  0x21   : > { %572 = dma.hbm_to_vmem [thread:$0]  (!%p845_p0), %s215_s14, 256, %s218_s16, %s204_s24  }
  0x22   : > { %p223_p11 = pnand %p551_p1, %p222_p2 }
  0x23   : > { %s860_s28 = sand.u32 (!%p223_p11), 1, %s722_s19  }
  0x24   : > { %226 = sbr.rel (%p223_p11) target bundleno = 461 (0x1cd), region = 40  ;;  %s552_s9 = sshll.u32 (!%p223_p11), %s860_s28, 4 }
  0x25   : > { %s229_s11 = scalar_lea.sflag (!%p223_p11), [#allocation3], %s860_s28  ;;  %s232_s12 = scalar_lea.vmem (!%p223_p11), [#allocation2], %s552_s9 }
  0x29   : > { %709 = dma.done.wait (%p821_p8), %s229_s11, 256  }
  0x2a   : > { %711 = vsyncadd (%p821_p8), %s229_s11, 4294967040  ;;  %v741_v0 = vmov 0.0   ;;  %v742_v1 = vmov 0   ;;  %v262_v2 = vld [vmem:[%s232_s12 + $0x8] sm:$0xff]  ;;  %v261_v3 = vld [vmem:[%s232_s12] sm:$0xff]  ;;  %vm270_vm0 = vcmask 64512  }
  0x2b   : > { %338 = vmatprep.mubr.f32.mxu0 %v741_v0  ;;  %629 = vset.pattern.permute.xlu0 %v742_v1  ;;  %v263_v4 = vld [vmem:[%s922_s1] sm:$0xf]  ;;  %vm358_vm1 = vcmask 1043456   ;;  %vm354_vm2 = vcmask 31744   ;;  %s553_s27 = sshll.u32 %s860_s28, 3  ;;  %s564_s29 = sshll.u32 %s730_s21, 7 }
  0x2c   : > { %429 = vmatprep.mubr.f32.mxu1 %v741_v0  ;;  %304 = vmatprep.subr.mxu0 %v262_v2  ;;  %v264_v5 = vld [vmem:[%s923_s2] sm:$0xf]  ;;  %s258_s10 = scalar_lea.vmem [#allocation5], %s553_s27  ;;  %s458_s13 = scalar_lea.hbm %s926_s5, %s564_s29 }
  0x2d   : > { %305 = vmatpush1.msra.mxu0 %v261_v3  ;;  %267 = vperm.xlu0 %629, %v264_v5   ;;  %v348_v6 = vld [vmem:[%s925_s4] sm:$0xf]  ;;  %s460_s9 = sshll.u32 %s258_s10, 4  ;;  %s444_s14 = scalar_lea.sflag [#allocation4], %s860_s28  ;;  %s461_s9 = int_to_ptr.vmem [resolvable:$true] %s460_s9 }
  0x2e   : > { %554 = vmatmul.mubr.msk.f32.vlgmr.msra.gmra.mxu0 %vm270_vm0, %v263_v4  ;;  %v347_v14 = vld [vmem:[%s924_s3] sm:$0xf]  ;;  %s658_s15 = scalar_lea.vmem %s461_s9, 128  ;;  %s743_s16 = smov [#allocation5]  }
  0x2f   : > { %p659_p8 = scmp.ne.s32.totalorder %s461_s9, %s658_s15  ;;  %s662_s30 = sshll.u32 %s743_s16, 4  ;;  %s663_s30 = int_to_ptr.vmem [resolvable:$false] %s662_s30 }
  0x30   : > { %s664_s21 = scalar_lea.vmem %s663_s30, 256  ;;  %p665_p0 = scmp.lt.s32.totalorder %s461_s9, %s663_s30 }
  0x31   : > { %351 = vperm.xlu0 %629, %v348_v6   ;;  %p660_p11 = pnand %p659_p8, %p825_p9  ;;  %p666_p1 = scmp.lt.s32.totalorder %s664_s21, %s658_s15 }
  0x33   : > { %p661_p12 = pneg %p660_p11  ;;  %p667_p2 = por %p666_p1, %p665_p0 }
  0x35   : > { %p668_p3 = pnand %p667_p2, %p661_p12 }
  0xa8   : > { %v268_v8 = vpop.permute.xlu0 %267 }
  0xac   : > { %v352_v15 = vpop.permute.xlu0 %351 }
  0xee   : > { %v340_v7 = vpop.f32.mrf.mxu0 }
  0xef   : > { %v341_v9 = vadd.f32 %v340_v7, %v268_v8 }
  0xf0   : > { %v342_v10 = vpop.f32.mrf.mxu0 }
  0xf1   : > { %v343_v11 = vadd.f32 %v342_v10, %v268_v8  ;;  %v345_v13 = vmax.f32 %v341_v9, 0.0 }
  0xf3   : > { %v346_v12 = vmax.f32 %v343_v11, 0.0 }
  0xf5   : > { %555 = vmatprep.subr.msk.mxu1 %vm358_vm1, %v346_v12 }
  0xf6   : > { %556 = vmatpush1.msk.msra.mxu1 %vm358_vm1, %v345_v13 }
  0xf7   : > { %557 = vmatmul.mubr.msk.f32.vlgmr.msra.gmra.mxu1 %vm354_vm2, %v347_v14 }
 0x1b7   : > { %v431_v16 = vpop.f32.mrf.mxu1 }
 0x1b8   : > { %v432_v17 = vadd.f32 %v431_v16, %v352_v15 }
 0x1b9   : > { %v433_v18 = vpop.f32.mrf.mxu1 }
 0x1ba   : > { %v434_v19 = vadd.f32 %v433_v18, %v352_v15  ;;  %v436_v20 = vmax.f32 %v432_v17, 0.0 }
 0x1bc   : > { %v437_v21 = vmax.f32 %v434_v19, 0.0 }
 0x1be   : > { %v440_v22 = vcombine.low %v436_v20, %v437_v21 }
 0x1c0   : > { %442 = vst [vmem:[%s258_s10] sm:$0xff] %v440_v22 }
 0x1c1   : > { %671 = shalt.err (!%p668_p3)
}
 0x1c2   : > { %s672_s17 = scalar_lea.hbm %s458_s13, 128  ;;  %s676_s25 = scalar_lea.hbm %s926_s5, 256 }
 0x1c3   : > { %p673_p5 = scmp.ne.s32.totalorder %s458_s13, %s672_s17  ;;  %p677_p10 = scmp.lt.s32.totalorder %s458_s13, %s926_s5 }
 0x1c4   : > { %p678_p4 = scmp.lt.s32.totalorder %s676_s25, %s672_s17 }
 0x1c5   : > { %p674_p6 = pnand %p673_p5, %p825_p9 }
 0x1c6   : > { %p679_p13 = por %p678_p4, %p677_p10 }
 0x1c7   : > { %p675_p7 = pneg %p674_p6 }
 0x1c9   : > { %p680_p8 = pnand %p679_p13, %p675_p7 }
 0x1cb   : > { %683 = shalt.err (!%p680_p8)
}
 0x1cc   : > { %567 = dma.vmem_to_hbm [thread:$0]  (%p825_p9), %s461_s9, 128, %s458_s13, %s444_s14  }
 0x1cd PF: > { %s472_s10 = sand.u32 1, %s718_s18   ;;  %p932_p11 = scmp.ne.s32.totalorder %s930_s8, 0 }
 0x1ce   : > { %p933_p12 = scmp.ge.s32.totalorder %s738_s23, 2  ;;  %s473_s11 = scalar_lea.sflag [#allocation4], %s472_s10 }
 0x1d0   : > { %p574_p0 = pnand %p933_p12, %p932_p11 }
 0x1d2   : > { %p575_p1 = pneg %p574_p0 }
 0x1d4   : > { %713 = dma.done.wait (%p575_p1), %s473_s11, 128  }
 0x1d5   : > { %715 = vsyncadd (%p575_p1), %s473_s11, 4294967168  ;;  %s21_s23 = sadd.s32 1, %s738_s23   ;;  %s934_s18 = smov %s722_s19 }
 0x1d6   : > { %p18_p2 = scmp.ge.s32.totalorder %s21_s23, 4   ;;  %s935_s19 = smov %s726_s20 }
 0x1d7   : > { %s936_s20 = smov %s830_s7  ;;  %s937_s21 = smov %s734_s22 }
 0x1d8   : > { %s938_s22 = smov %s940_s26  ;;  %20 = sbr.rel (!%p18_p2) target bundleno = 6 (0x6), region = 85 }
 0x1dd   :  { %478 = vsyncpa [#allocation3], 1 }
 0x1de   :  { %480 = vsyncpa [#allocation3 + $0x1], 1 }
 0x1df   :  { %481 = vsyncpa [#allocation4], 1 }
 0x1e0   :  { %483 = vsyncpa [#allocation4 + $0x1], 1 }

</bundles_post_ra>
